<compile_context>
chip_gen: v7x
topology: tpu7x:2x2x1
jax: 0.10.0
libtpu: 0.0.40
codegen_flags: <defaults>
</compile_context>

<pallas_src>
import jax
import jax.numpy as jnp
from jax.experimental import pallas as pl
from jax.experimental.pallas import tpu as pltpu


def _fused_linear_stack_kernel(x_ref, p_ref, o_ref):
    # x: (B, in_f)                with in_f == 2
    # p: (8, 128) packed params:  rows [0, in_f) = W^T (in_f, out_f) padded to 128 lanes,
    #                             row in_f       = bias (out_f,)     padded to 128 lanes.
    # o: (B, 2*out_f)             lanes [0:out_f] and [out_f:2*out_f] both hold y
    #                             (stack([y, y], dim=1) folded into the store).
    x = x_ref[...]
    p = p_ref[...]
    in_f = x.shape[1]
    out_f = o_ref.shape[-1] // 2

    # Unrolled VPU contraction over K=in_f (2): broadcast-multiply-add, no MXU.
    y = p[in_f:in_f + 1, :]                      # bias row, broadcasts over batch
    for k in range(in_f):                        # static unroll (in_f == 2)
        y = y + x[:, k:k + 1] * p[k:k + 1, :]

    yc = y[:, :out_f].astype(o_ref.dtype)
    o_ref[:, 0:out_f] = yc                       # two tiny masked stores: duplicate
    o_ref[:, out_f:2 * out_f] = yc               # the result along the stacked axis


def _pack_params(wm, bm, wt, bt):
    # Fold the two linears:  y = (x @ wm.T + bm) @ wt.T + bt
    #                          = x @ (wt @ wm).T + (bm @ wt.T + bt)
    w_fused = wt @ wm                            # (out_f, in_f) = (3, 2)
    b_fused = bm @ wt.T + bt                     # (out_f,)      = (3,)
    w_t = w_fused.T                              # (in_f, out_f) = (2, 3), pre-transposed

    in_f, out_f = w_t.shape
    # Pack W^T and b into a single (8, 128) f32 block -> one parameter DMA.
    # zeros base keeps the padded lanes finite (hygiene; they are sliced off in-kernel).
    params = jnp.zeros((8, 128), dtype=jnp.float32)
    params = params.at[0:in_f, 0:out_f].set(w_t.astype(jnp.float32))
    params = params.at[in_f, 0:out_f].set(b_fused.astype(jnp.float32))
    return params, in_f, out_f


def make_model_forward(wm, bm, wt, bt):
    """Builds a jitted forward.  Weight fold + packing happen exactly once, here."""
    params, in_f, out_f = _pack_params(wm, bm, wt, bt)
    params = jax.device_put(params)              # resident; closed over by the jit

    @jax.jit
    def forward(x):
        B = x.shape[0]
        # No grid: whole arrays land in VMEM, single kernel invocation, single TC.
        y2 = pl.pallas_call(
            _fused_linear_stack_kernel,
            out_shape=jax.ShapeDtypeStruct((B, 2 * out_f), x.dtype),
            in_specs=[
                pl.BlockSpec(memory_space=pltpu.MemorySpace.VMEM),   # x
                pl.BlockSpec(memory_space=pltpu.MemorySpace.VMEM),   # packed params
            ],
            out_specs=pl.BlockSpec(memory_space=pltpu.MemorySpace.VMEM),
        )(x, params)
        # Free row-major reshape: lanes [0:out_f] / [out_f:2*out_f] -> stacked dim=1.
        return y2.reshape(B, 2, out_f)

    return forward


if __name__ == "__main__":
    key = jax.random.PRNGKey(0)
    k_x, k_wm, k_bm, k_wt, k_bt = jax.random.split(key, 5)

    # Input: torch.randn(2, 2)
    x = jax.random.normal(k_x, (2, 2), dtype=jnp.float32)

    # Deterministic parameter init (uniform like PyTorch Linear default ranges).
    wm = jax.random.uniform(k_wm, (3, 2), jnp.float32, -0.7, 0.7)    # Linear(2, 3)
    bm = jax.random.uniform(k_bm, (3,), jnp.float32, -0.7, 0.7)
    wt = jax.random.uniform(k_wt, (3, 3), jnp.float32, -0.57, 0.57)  # second linear (3 -> 3)
    bt = jax.random.uniform(k_bt, (3,), jnp.float32, -0.57, 0.57)

    forward = make_model_forward(wm, bm, wt, bt)
    out = forward(x)
    out = jax.block_until_ready(out)

    # Pure-JAX reference check (unfused two-step computation).
    y1 = x @ wm.T + bm
    y2 = y1 @ wt.T + bt
    ref = jnp.stack([y2, y2], axis=1)
    assert out.shape == (2, 2, 3), out.shape
    assert jnp.allclose(out, ref, atol=1e-5, rtol=1e-5)

    print("KERNEL_OK")
</pallas_src>

<mosaic_0001>
module attributes {stable_mosaic.version = 11 : i64} {
  func.func @_fused_linear_stack_kernel(%arg0: memref<2x2xf32, #tpu.memory_space<vmem>>, %arg1: memref<8x128xf32, #tpu.memory_space<vmem>>, %arg2: memref<2x6xf32, #tpu.memory_space<vmem>>) attributes {dimension_semantics = [], scalar_prefetch = 0 : i64, scratch_operands = 0 : i64, tpu.core_type = #tpu.core_type<tc>} {
    %c0 = arith.constant 0 : index
    %c0_0 = arith.constant 0 : index
    %0 = vector.load %arg0[%c0, %c0_0] : memref<2x2xf32, #tpu.memory_space<vmem>>, vector<2x2xf32>
    %c0_1 = arith.constant 0 : index
    %c0_2 = arith.constant 0 : index
    %1 = vector.load %arg1[%c0_1, %c0_2] : memref<8x128xf32, #tpu.memory_space<vmem>>, vector<8x128xf32>
    %2 = vector.extract_strided_slice %1 {offsets = [2, 0], sizes = [1, 128], strides = [1, 1]} : vector<8x128xf32> to vector<1x128xf32>
    %3 = vector.extract_strided_slice %0 {offsets = [0, 0], sizes = [2, 1], strides = [1, 1]} : vector<2x2xf32> to vector<2x1xf32>
    %4 = vector.extract_strided_slice %1 {offsets = [0, 0], sizes = [1, 128], strides = [1, 1]} : vector<8x128xf32> to vector<1x128xf32>
    %5 = vector.broadcast %3 : vector<2x1xf32> to vector<2x128xf32>
    %6 = vector.broadcast %4 : vector<1x128xf32> to vector<2x128xf32>
    %7 = arith.mulf %5, %6 : vector<2x128xf32>
    %8 = vector.broadcast %2 : vector<1x128xf32> to vector<2x128xf32>
    %9 = arith.addf %8, %7 : vector<2x128xf32>
    %10 = vector.extract_strided_slice %0 {offsets = [0, 1], sizes = [2, 1], strides = [1, 1]} : vector<2x2xf32> to vector<2x1xf32>
    %11 = vector.extract_strided_slice %1 {offsets = [1, 0], sizes = [1, 128], strides = [1, 1]} : vector<8x128xf32> to vector<1x128xf32>
    %12 = vector.broadcast %10 : vector<2x1xf32> to vector<2x128xf32>
    %13 = vector.broadcast %11 : vector<1x128xf32> to vector<2x128xf32>
    %14 = arith.mulf %12, %13 : vector<2x128xf32>
    %15 = arith.addf %9, %14 : vector<2x128xf32>
    %16 = vector.extract_strided_slice %15 {offsets = [0, 0], sizes = [2, 3], strides = [1, 1]} : vector<2x128xf32> to vector<2x3xf32>
    %c0_3 = arith.constant 0 : index
    %c0_4 = arith.constant 0 : index
    %17 = vector.load %arg2[%c0_3, %c0_4] : memref<2x6xf32, #tpu.memory_space<vmem>>, vector<2x3xf32>
    tpu.vector_store %arg2[%c0_3, %c0_4], %16 {strides = array<i32>} : memref<2x6xf32, #tpu.memory_space<vmem>>, vector<2x3xf32>,
    %c0_5 = arith.constant 0 : index
    %c3 = arith.constant 3 : index
    %18 = vector.load %arg2[%c0_5, %c3] : memref<2x6xf32, #tpu.memory_space<vmem>>, vector<2x3xf32>
    tpu.vector_store %arg2[%c0_5, %c3], %16 {strides = array<i32>} : memref<2x6xf32, #tpu.memory_space<vmem>>, vector<2x3xf32>,
    return
  }
}

</mosaic_0001>

<bundles_post_ra>
// kernel: forward.1
= control target key start
LH: loop header
LB: loop body
LE: loop exit
PB: predicated region body
PF: predicated region fallthrough
CT: control target
= control target key end

     0   :  { %7 = vsyncpa [#allocation3], 0  ;;  %s181_s0 = inlined_call_operand.hbm [shape: f32[2,2], index: 0, kind: input, shape index: {}]   ;;  %s182_s1 = inlined_call_operand.hbm [shape: f32[8,128], index: 1, kind: input, shape index: {}]   ;;  %s183_s2 = inlined_call_operand.vmem [shape: f32[2,6], index: 2, kind: output, shape index: {}]  }
   0x1   :  { %8 = vsyncpa [#allocation5], 0  ;;  %s131_s9 = smov [#allocation2]   ;;  %s132_s11 = smov [#allocation4]  }
   0x2   :  { %s15_s10 = sshll.u32 %s131_s9, 4  ;;  %s25_s12 = sshll.u32 %s132_s11, 4  ;;  %s16_s10 = int_to_ptr.vmem [resolvable:$true] %s15_s10  ;;  %s26_s12 = int_to_ptr.vmem [resolvable:$true] %s25_s12 }
   0x3   :  { %s83_s15 = scalar_lea.hbm %s181_s0, 32 }
   0x4   :  { %p84_p0 = scmp.ne.s32.totalorder %s181_s0, %s83_s15  ;;  %p87_p1 = scmp.lt.u32.totalorder %s83_s15, %s181_s0 }
   0x6   :  { %p89_p2 = pnand %p87_p1, %p84_p0 }
   0x8   :  { %92 = shalt.err (!%p89_p2)
}
   0x9   :  { %s93_s20 = scalar_lea.vmem %s16_s10, 32  ;;  %p98_p4 = scmp.lt.s32.totalorder %s16_s10, %s16_s10 }
   0xa   :  { %p94_p3 = scmp.ne.s32.totalorder %s16_s10, %s93_s20  ;;  %p99_p5 = scmp.lt.s32.totalorder %s93_s20, %s93_s20 }
   0xc   :  { %p100_p6 = por %p99_p5, %p98_p4 }
   0xe   :  { %p101_p7 = pnand %p100_p6, %p94_p3 }
  0x10   :  { %104 = shalt.err (!%p101_p7)
}
  0x11   :  { %18 = dma.hbm_to_vmem [thread:$0]  %s181_s0, 32, %s16_s10, [#allocation3]  }
  0x12   :  { %s105_s25 = scalar_lea.hbm %s182_s1, 128 }
  0x13   :  { %p106_p8 = scmp.ne.s32.totalorder %s182_s1, %s105_s25  ;;  %p109_p9 = scmp.lt.u32.totalorder %s105_s25, %s182_s1 }
  0x15   :  { %p111_p10 = pnand %p109_p9, %p106_p8 }
  0x17   :  { %114 = shalt.err (!%p111_p10)
}
  0x18   :  { %s115_s30 = scalar_lea.vmem %s26_s12, 128  ;;  %p120_p12 = scmp.lt.s32.totalorder %s26_s12, %s26_s12 }
  0x19   :  { %p116_p11 = scmp.ne.s32.totalorder %s26_s12, %s115_s30  ;;  %p121_p13 = scmp.lt.s32.totalorder %s115_s30, %s115_s30 }
  0x1b   :  { %p122_p0 = por %p121_p13, %p120_p12 }
  0x1d   :  { %p123_p1 = pnand %p122_p0, %p116_p11 }
  0x1f   :  { %126 = shalt.err (!%p123_p1)
}
  0x20   :  { %28 = dma.hbm_to_vmem [thread:$0]  %s182_s1, 128, %s26_s12, [#allocation5]  }
  0x21   :  { %127 = dma.done.wait [#allocation3], 32  }
  0x22   :  { %128 = vsyncadd [#allocation3], 4294967264 }
  0x23   :  { %129 = dma.done.wait [#allocation5], 128  }
  0x24   :  { %130 = vsyncadd [#allocation5], 4294967168  ;;  %v133_v0 = vmov 0   ;;  %v35_v1 = vld [vmem:[#allocation2] sm:$0x3]  ;;  %v134_v2 = vmov 1   ;;  %v42_v3 = vlaneseq }
  0x25   :  { %81 = vset.pattern.permute.xlu0 %v133_v0  ;;  %v36_v6 = vld [vmem:[#allocation4] sm:$0xff]  ;;  %vm62_vm0 = vcmask 17408   ;;  %s135_s1 = smov 3   ;;  %vm68_vm1 = vcmask 42008  }
  0x26   :  { %39 = vperm.xlu0 %81, %v35_v1   ;;  %v43_v4 = vshrl.u32 %v42_v3, 7 }
  0x28   :  { %v44_v5 = vsub.s32 0, %v43_v4  ;;  %v49_v8 = vsub.s32 2, %v43_v4  ;;  %v58_v9 = vsub.s32 1, %v43_v4 }
  0x2a   :  { %82 = vset.pattern.permute.xlu0 %v134_v2  ;;  %v45_v7 = vrot.slane %v36_v6, %v44_v5  ;;  %v50_v11 = vrot.slane %v36_v6, %v49_v8  ;;  %v59_v13 = vrot.slane %v36_v6, %v58_v9 }
  0x2b   :  { %53 = vperm.xlu0 %82, %v35_v1  }
  0xa5   :  { %v40_v10 = vpop.permute.xlu0 %39 }
  0xa6   :  { %v46_v12 = vmul.f32 %v45_v7, %v40_v10 }
  0xa8   :  { %v51_v15 = vadd.f32 %v50_v11, %v46_v12 }
  0xaa   :  { %v54_v14 = vpop.permute.xlu0 %53 }
  0xab   :  { %v60_v16 = vmul.f32 %v59_v13, %v54_v14 }
  0xad   :  { %v61_v17 = vadd.f32 %v60_v16, %v51_v15 }
  0xaf   :  { %65 = vrot.lane.b32.xlu1 %v61_v17, %s135_s1  ;;  %63 = vst.msk [vmem:[%s183_s2] sm:$0x3] %vm62_vm0, %v61_v17 }
 0x121   :  { %v66_v18 = vpop.permute.xlu1 %65 }
 0x122   :  { %69 = vst.msk [vmem:[%s183_s2] sm:$0x3] %vm68_vm1, %v66_v18 }
 0x123   :  { %74 = vsyncpa [#allocation3], 1 }
 0x124   :  { %75 = vsyncpa [#allocation5], 1 }

</bundles_post_ra>
